<compile_context>
chip_gen: v6e
topology: v6e:2x2x1
jax: 0.10.0
libtpu: 0.0.40
codegen_flags: <defaults>
</compile_context>

<pallas_src>
import functools

import jax
import jax.numpy as jnp
import numpy as np
from jax.experimental import pallas as pl
from jax.experimental.pallas import tpu as pltpu


def _gn_bn_kernel(x_ref, gamma_ref, beta_ref, s_ref, o_ref, *, eps):
    # Block shapes (per grid step = one channel group):
    #   x_ref, o_ref : (N, 1, S, T)   with S*T == Cg*H*W
    #   gamma_ref    : (1, 1, S, T)   per-channel affine, pre-broadcast
    #   beta_ref     : (1, 1, S, T)
    #   s_ref        : (1,) in SMEM   == sigmoid(lambda)
    x = x_ref[...].astype(jnp.float32)            # (N, 1, S, T)
    # TODO(synk): for bf16 inputs at very large per-group sizes, stream the
    # accumulation instead of widening the whole resident tile to f32.
    n = x.shape[0]
    n_gn = x.shape[2] * x.shape[3]

    # ---- GroupNorm stats: one-pass sum / sum-of-squares over (S, T) ----
    s1 = jnp.sum(x, axis=(2, 3), keepdims=True)               # (N,1,1,1)
    s2 = jnp.sum(x * x, axis=(2, 3), keepdims=True)           # (N,1,1,1)
    mean_gn = s1 * (1.0 / n_gn)
    # unbiased variance (torch.std ddof=1 semantics)
    var_gn = (s2 - n_gn * mean_gn * mean_gn) * (1.0 / (n_gn - 1))
    var_gn = jnp.maximum(var_gn, 0.0)
    inv_gn = 1.0 / (jnp.sqrt(var_gn) + eps)                   # tiny-tensor divide
    x_gn = (x - mean_gn) * inv_gn                             # (N,1,S,T)

    # ---- BatchNorm-like stats over N (two-pass; see header note) ----
    mean_bn = jnp.sum(x_gn, axis=0, keepdims=True) * (1.0 / n)       # (1,1,S,T)
    diff_bn = x_gn - mean_bn                                          # (N,1,S,T)
    var_bn = jnp.sum(diff_bn * diff_bn, axis=0, keepdims=True) * (1.0 / (n - 1))
    inv_bn = 1.0 / (jnp.sqrt(var_bn) + eps)                           # (1,1,S,T)

    # ---- blend + affine folded into per-group coefficients (1/N of x) ----
    s = s_ref[0]                                    # sigmoid(lambda), SMEM scalar
    gamma = gamma_ref[...].astype(jnp.float32)      # (1,1,S,T)
    beta = beta_ref[...].astype(jnp.float32)        # (1,1,S,T)
    c_gn = gamma * s                                # coefficient of x_gn
    c_bn = gamma * ((1.0 - s) * inv_bn)             # coefficient of (x_gn - mean_bn)
    out = c_gn * x_gn + (c_bn * diff_bn + beta)
    o_ref[...] = out.astype(o_ref.dtype)


def gn_plus_sequential_gn_first(x, gamma, beta, lam, *, group_num, eps=1e-5):
    """x: (N, C, H, W); gamma/beta: (C, 1, 1); lam: (1,). Returns (N, C, H, W)."""
    N, C, H, W = x.shape
    G = group_num
    Cg = C // G
    HW = H * W
    L = Cg * HW

    # Lane-dense layout: flatten (Cg, H, W) -> L, split into (S, 128) when
    # possible (free reshape, no transpose).  Otherwise keep (Cg, HW).
    if L % 128 == 0:
        S, T = L // 128, 128
    else:
        S, T = Cg, HW
    x4 = x.reshape(N, G, S, T)

    # Per-channel affine params pre-broadcast to the per-group (S, T) layout
    # (tiny wrapper-side op, 1/N the size of x).
    gamma4 = jnp.broadcast_to(
        gamma.reshape(G, Cg, 1).astype(jnp.float32), (G, Cg, HW)
    ).reshape(1, G, S, T)
    beta4 = jnp.broadcast_to(
        beta.reshape(G, Cg, 1).astype(jnp.float32), (G, Cg, HW)
    ).reshape(1, G, S, T)

    # sigmoid(lambda) is a single scalar: compute once, pass through SMEM.
    s_blend = jax.nn.sigmoid(lam.reshape(1).astype(jnp.float32))

    idx = lambda g: (0, g, 0, 0)

    out4 = pl.pallas_call(
        functools.partial(_gn_bn_kernel, eps=eps),
        out_shape=jax.ShapeDtypeStruct((N, G, S, T), x.dtype),
        grid=(G,),
        in_specs=[
            pl.BlockSpec((N, 1, S, T), idx),
            pl.BlockSpec((1, 1, S, T), idx),
            pl.BlockSpec((1, 1, S, T), idx),
            pl.BlockSpec(memory_space=pltpu.MemorySpace.SMEM),
        ],
        out_specs=pl.BlockSpec((N, 1, S, T), idx),
        compiler_params=pltpu.CompilerParams(
            dimension_semantics=("parallel",),
            vmem_limit_bytes=64 * 1024 * 1024,
        ),
    )(x4, gamma4, beta4, s_blend)

    # TODO(synk): if a single (N, 1, S, T) group tile exceeds the per-gen VMEM
    # budget (notably v7x's 64 MiB), add a second "arbitrary" grid axis over L
    # and accumulate GN/BN partial sums in VMEM scratch.
    return out4.reshape(N, C, H, W)


def reference(x, gamma, beta, lam, *, group_num, eps=1e-5):
    """Pure-jnp mirror of the PyTorch forward (unbiased std, NCHW)."""
    N, C, H, W = x.shape
    G = group_num
    xg = x.reshape(N, G, C // G, H, W)
    mean_gn = jnp.mean(xg, axis=(2, 3, 4), keepdims=True)
    std_gn = jnp.std(xg, axis=(2, 3, 4), keepdims=True, ddof=1)
    xg = (xg - mean_gn) / (std_gn + eps)
    x_gn = xg.reshape(N, C, H, W)
    mean_bn = jnp.mean(x_gn, axis=0, keepdims=True)
    std_bn = jnp.std(x_gn, axis=0, keepdims=True, ddof=1)
    x_bn = (x_gn - mean_bn) / (std_bn + eps)
    s = jax.nn.sigmoid(lam[0])
    g = gamma.reshape(1, C, 1, 1)
    b = beta.reshape(1, C, 1, 1)
    return (s * x_gn + (1.0 - s) * x_bn) * g + b


if __name__ == "__main__":
    # Small shapes consistent with the module: N=2, C=4, H=W=16, group_num=2
    N, C, H, W = 2, 4, 16, 16
    GROUP_NUM = 2
    EPS = 1e-5

    key = jax.random.PRNGKey(0)
    kx, kg, kb, kl = jax.random.split(key, 4)
    x = jax.random.normal(kx, (N, C, H, W), dtype=jnp.float32)

    # Deterministic parameter init (module __init__ gives shapes; perturb so
    # the affine / blend paths are actually exercised).
    gamma = jnp.ones((C, 1, 1), jnp.float32) + 0.1 * jax.random.normal(kg, (C, 1, 1))
    beta = 0.1 * jax.random.normal(kb, (C, 1, 1), dtype=jnp.float32)
    lam = jnp.ones((1,), jnp.float32) + 0.1 * jax.random.normal(kl, (1,))

    out = gn_plus_sequential_gn_first(x, gamma, beta, lam, group_num=GROUP_NUM, eps=EPS)
    out = jax.block_until_ready(out)

    ref = reference(x, gamma, beta, lam, group_num=GROUP_NUM, eps=EPS)
    # Tolerance note: the BN divide by (std_bn + 1e-5) legitimately amplifies
    # f32 rounding noise at near-degenerate positions (tiny cross-batch std),
    # so parity is checked at 5e-4 rather than machine-level tolerance.
    np.testing.assert_allclose(np.asarray(out), np.asarray(ref), rtol=5e-4, atol=5e-4)

    print("KERNEL_OK")
</pallas_src>

<mosaic_0001>
module attributes {stable_mosaic.version = 11 : i64} {
  func.func @_gn_bn_kernel(%arg0: i32, %arg1: memref<2x1x4x128xf32, #tpu.memory_space<vmem>>, %arg2: memref<1x1x4x128xf32, #tpu.memory_space<vmem>>, %arg3: memref<1x1x4x128xf32, #tpu.memory_space<vmem>>, %arg4: memref<1xf32, #tpu.memory_space<smem>>, %arg5: memref<2x1x4x128xf32, #tpu.memory_space<vmem>>) attributes {dimension_semantics = [#tpu.dimension_semantics<parallel>], iteration_bounds = array<i64: 2>, scalar_prefetch = 0 : i64, scratch_operands = 0 : i64, tpu.core_type = #tpu.core_type<tc>, window_params = [{transform_indices = @transform_0, window_bounds = array<i64: 2, 1, 4, 128>}, {transform_indices = @transform_1, window_bounds = array<i64: 1, 1, 4, 128>}, {transform_indices = @transform_2, window_bounds = array<i64: 1, 1, 4, 128>}, {transform_indices = @transform_3, window_bounds = array<i64: 1>}, {transform_indices = @transform_4, window_bounds = array<i64: 2, 1, 4, 128>}]} {
    %c0 = arith.constant 0 : index
    %c0_0 = arith.constant 0 : index
    %c0_1 = arith.constant 0 : index
    %c0_2 = arith.constant 0 : index
    %0 = vector.load %arg1[%c0, %c0_0, %c0_1, %c0_2] : memref<2x1x4x128xf32, #tpu.memory_space<vmem>>, vector<2x1x4x128xf32>
    %cst = arith.constant dense<0.000000e+00> : vector<2x1xf32>
    %1 = vector.multi_reduction <add>, %0, %cst [2, 3] : vector<2x1x4x128xf32> to vector<2x1xf32>
    %2 = vector.shape_cast %1 : vector<2x1xf32> to vector<2x1x1x1xf32>
    %3 = arith.mulf %0, %0 : vector<2x1x4x128xf32>
    %cst_3 = arith.constant dense<0.000000e+00> : vector<2x1xf32>
    %4 = vector.multi_reduction <add>, %3, %cst_3 [2, 3] : vector<2x1x4x128xf32> to vector<2x1xf32>
    %5 = vector.shape_cast %4 : vector<2x1xf32> to vector<2x1x1x1xf32>
    %cst_4 = arith.constant 0.001953125 : f32
    %6 = vector.broadcast %cst_4 : f32 to vector<2x1x1x1xf32>
    %7 = arith.mulf %2, %6 : vector<2x1x1x1xf32>
    %cst_5 = arith.constant 5.120000e+02 : f32
    %8 = vector.broadcast %cst_5 : f32 to vector<2x1x1x1xf32>
    %9 = arith.mulf %8, %7 : vector<2x1x1x1xf32>
    %10 = arith.mulf %9, %7 : vector<2x1x1x1xf32>
    %11 = arith.subf %5, %10 : vector<2x1x1x1xf32>
    %cst_6 = arith.constant 0.00195694715 : f32
    %12 = vector.broadcast %cst_6 : f32 to vector<2x1x1x1xf32>
    %13 = arith.mulf %11, %12 : vector<2x1x1x1xf32>
    %cst_7 = arith.constant 0.000000e+00 : f32
    %14 = vector.broadcast %cst_7 : f32 to vector<2x1x1x1xf32>
    %15 = arith.maximumf %13, %14 : vector<2x1x1x1xf32>
    %16 = math.sqrt %15 : vector<2x1x1x1xf32>
    %cst_8 = arith.constant 9.99999974E-6 : f32
    %17 = vector.broadcast %cst_8 : f32 to vector<2x1x1x1xf32>
    %18 = arith.addf %16, %17 : vector<2x1x1x1xf32>
    %cst_9 = arith.constant 1.000000e+00 : f32
    %19 = vector.broadcast %cst_9 : f32 to vector<2x1x1x1xf32>
    %20 = arith.divf %19, %18 : vector<2x1x1x1xf32>
    %21 = vector.broadcast %7 : vector<2x1x1x1xf32> to vector<2x1x4x128xf32>
    %22 = arith.subf %0, %21 : vector<2x1x4x128xf32>
    %23 = vector.broadcast %20 : vector<2x1x1x1xf32> to vector<2x1x4x128xf32>
    %24 = arith.mulf %22, %23 : vector<2x1x4x128xf32>
    %cst_10 = arith.constant dense<0.000000e+00> : vector<1x4x128xf32>
    %25 = vector.multi_reduction <add>, %24, %cst_10 [0] : vector<2x1x4x128xf32> to vector<1x4x128xf32>
    %26 = vector.shape_cast %25 : vector<1x4x128xf32> to vector<1x1x4x128xf32>
    %cst_11 = arith.constant 5.000000e-01 : f32
    %27 = vector.broadcast %cst_11 : f32 to vector<1x1x4x128xf32>
    %28 = arith.mulf %26, %27 : vector<1x1x4x128xf32>
    %29 = vector.broadcast %28 : vector<1x1x4x128xf32> to vector<2x1x4x128xf32>
    %30 = arith.subf %24, %29 : vector<2x1x4x128xf32>
    %31 = arith.mulf %30, %30 : vector<2x1x4x128xf32>
    %cst_12 = arith.constant dense<0.000000e+00> : vector<1x4x128xf32>
    %32 = vector.multi_reduction <add>, %31, %cst_12 [0] : vector<2x1x4x128xf32> to vector<1x4x128xf32>
    %33 = vector.shape_cast %32 : vector<1x4x128xf32> to vector<1x1x4x128xf32>
    %cst_13 = arith.constant 1.000000e+00 : f32
    %34 = vector.broadcast %cst_13 : f32 to vector<1x1x4x128xf32>
    %35 = arith.mulf %33, %34 : vector<1x1x4x128xf32>
    %36 = math.sqrt %35 : vector<1x1x4x128xf32>
    %cst_14 = arith.constant 9.99999974E-6 : f32
    %37 = vector.broadcast %cst_14 : f32 to vector<1x1x4x128xf32>
    %38 = arith.addf %36, %37 : vector<1x1x4x128xf32>
    %cst_15 = arith.constant 1.000000e+00 : f32
    %39 = vector.broadcast %cst_15 : f32 to vector<1x1x4x128xf32>
    %40 = arith.divf %39, %38 : vector<1x1x4x128xf32>
    %c0_16 = arith.constant 0 : index
    %41 = memref.load %arg4[%c0_16] : memref<1xf32, #tpu.memory_space<smem>>
    %c0_17 = arith.constant 0 : index
    %c0_18 = arith.constant 0 : index
    %c0_19 = arith.constant 0 : index
    %c0_20 = arith.constant 0 : index
    %42 = vector.load %arg2[%c0_17, %c0_18, %c0_19, %c0_20] : memref<1x1x4x128xf32, #tpu.memory_space<vmem>>, vector<1x1x4x128xf32>
    %c0_21 = arith.constant 0 : index
    %c0_22 = arith.constant 0 : index
    %c0_23 = arith.constant 0 : index
    %c0_24 = arith.constant 0 : index
    %43 = vector.load %arg3[%c0_21, %c0_22, %c0_23, %c0_24] : memref<1x1x4x128xf32, #tpu.memory_space<vmem>>, vector<1x1x4x128xf32>
    %44 = vector.broadcast %41 : f32 to vector<1x1x4x128xf32>
    %45 = arith.mulf %42, %44 : vector<1x1x4x128xf32>
    %cst_25 = arith.constant 1.000000e+00 : f32
    %46 = arith.subf %cst_25, %41 : f32
    %47 = vector.broadcast %46 : f32 to vector<1x1x4x128xf32>
    %48 = arith.mulf %47, %40 : vector<1x1x4x128xf32>
    %49 = arith.mulf %42, %48 : vector<1x1x4x128xf32>
    %50 = vector.broadcast %45 : vector<1x1x4x128xf32> to vector<2x1x4x128xf32>
    %51 = arith.mulf %50, %24 : vector<2x1x4x128xf32>
    %52 = vector.broadcast %49 : vector<1x1x4x128xf32> to vector<2x1x4x128xf32>
    %53 = arith.mulf %52, %30 : vector<2x1x4x128xf32>
    %54 = vector.broadcast %43 : vector<1x1x4x128xf32> to vector<2x1x4x128xf32>
    %55 = arith.addf %53, %54 : vector<2x1x4x128xf32>
    %56 = arith.addf %51, %55 : vector<2x1x4x128xf32>
    %c0_26 = arith.constant 0 : index
    %c0_27 = arith.constant 0 : index
    %c0_28 = arith.constant 0 : index
    %c0_29 = arith.constant 0 : index
    %57 = vector.load %arg5[%c0_26, %c0_27, %c0_28, %c0_29] : memref<2x1x4x128xf32, #tpu.memory_space<vmem>>, vector<2x1x4x128xf32>
    tpu.vector_store %arg5[%c0_26, %c0_27, %c0_28, %c0_29], %56 {strides = array<i32>} : memref<2x1x4x128xf32, #tpu.memory_space<vmem>>, vector<2x1x4x128xf32>,
    return
  }
  func.func @transform_0(%arg0: i32) -> (i32, i32, i32, i32) {
    %c0_i32 = arith.constant 0 : i32
    %c0_i32_0 = arith.constant 0 : i32
    %c0_i32_1 = arith.constant 0 : i32
    %c0_i32_2 = arith.constant 0 : i32
    return %c0_i32, %arg0, %c0_i32_0, %c0_i32_1 : i32, i32, i32, i32
  }
  func.func @transform_1(%arg0: i32) -> (i32, i32, i32, i32) {
    %c0_i32 = arith.constant 0 : i32
    %c0_i32_0 = arith.constant 0 : i32
    %c0_i32_1 = arith.constant 0 : i32
    %c0_i32_2 = arith.constant 0 : i32
    return %c0_i32, %arg0, %c0_i32_0, %c0_i32_1 : i32, i32, i32, i32
  }
  func.func @transform_2(%arg0: i32) -> (i32, i32, i32, i32) {
    %c0_i32 = arith.constant 0 : i32
    %c0_i32_0 = arith.constant 0 : i32
    %c0_i32_1 = arith.constant 0 : i32
    %c0_i32_2 = arith.constant 0 : i32
    return %c0_i32, %arg0, %c0_i32_0, %c0_i32_1 : i32, i32, i32, i32
  }
  func.func @transform_3(%arg0: i32) -> i32 {
    %c0_i32 = arith.constant 0 : i32
    %c0_i32_0 = arith.constant 0 : i32
    return %c0_i32 : i32
  }
  func.func @transform_4(%arg0: i32) -> (i32, i32, i32, i32) {
    %c0_i32 = arith.constant 0 : i32
    %c0_i32_0 = arith.constant 0 : i32
    %c0_i32_1 = arith.constant 0 : i32
    %c0_i32_2 = arith.constant 0 : i32
    return %c0_i32, %arg0, %c0_i32_0, %c0_i32_1 : i32, i32, i32, i32
  }
}

</mosaic_0001>

<bundles_post_ra>
// kernel: tpu_custom_call.1
= control target key start
LH: loop header
LB: loop body
LE: loop exit
PB: predicated region body
PF: predicated region fallthrough
CT: control target
= control target key end

     0   :  { %s1080_s0 = inlined_call_operand.hbm [shape: f32[2,2,4,128], index: 0, kind: input, shape index: {}]   ;;  %s1081_s1 = inlined_call_operand.hbm [shape: f32[1,2,4,128], index: 1, kind: input, shape index: {}]   ;;  %s1082_s2 = inlined_call_operand.hbm [shape: f32[1,2,4,128], index: 2, kind: input, shape index: {}]   ;;  %s1083_s3 = inlined_call_operand.<no memory space> [shape: f32[1], index: 3, kind: input, shape index: {}]   ;;  %s1084_s4 = inlined_call_operand.hbm [shape: f32[2,2,4,128], index: 4, kind: output, shape index: {}]  }
   0x1   :  { %1093 = sst [smem:[#allocation18_spill]] %s1080_s0 }
   0x2   :  { %1094 = sst [smem:[#allocation19_spill]] %s1081_s1 }
   0x3   :  { %9 = sst [smem:[#allocation2]] %s1083_s3 }
   0x4   :  { %10 = vsyncpa [#allocation4], 0 }
   0x5   :  { %12 = vsyncpa [#allocation4 + $0x1], 0 }
   0x6   :  { %13 = vsyncpa [#allocation7], 0 }
   0x7   :  { %15 = vsyncpa [#allocation7 + $0x1], 0 }
   0x8   :  { %16 = vsyncpa [#allocation5], 0 }
   0x9   :  { %18 = vsyncpa [#allocation5 + $0x1], 0  ;;  %s817_s17 = smov 0   ;;  %s819_s18 = smov 0  }
   0xa   :  { %s821_s19 = smov 0   ;;  %s823_s20 = smov 0  }
   0xb LB: > { %1095 = sst [smem:[#allocation13_spill]] %s773_s19  ;;  %s838_s3 = sadd.s32 4294967295, %s777_s20   ;;  %s777_s20 = sphi %s823_s20, %s1119_s20   ;;  %s773_s19 = sphi %s821_s19, %s1124_s19   ;;  %s769_s18 = sphi %s819_s18, %s1123_s18   ;;  %s765_s17 = sphi %s817_s17, %s1122_s17  }
   0xc   : > { %1096 = sst [smem:[#allocation14_spill]] %s777_s20  ;;  %s533_s21 = sadd.s32 4294967294, %s777_s20  }
   0xd   : > { %s842_s22 = sadd.s32 1, %s777_s20   ;;  %s31_s23 = sadd.s32 1, %s773_s19 }
   0xe   : > { %1097 = sst [smem:[#allocation15_spill]] %s842_s22  ;;  %s28_s24 = ssub.s32 %s777_s20, %s842_s22 }
   0xf   : > { %p38_p0 = scmp.ne.s32.totalorder %s773_s19, %s769_s18  ;;  %p29_p1 = scmp.eq.s32.totalorder %s28_s24, 0 }
  0x10   : > { %p39_p2 = scmp.eq.s32.totalorder %s777_s20, 0  ;;  %p44_p3 = scmp.ne.s32.totalorder %s769_s18, %s765_s17 }
  0x11   : > { %p45_p4 = scmp.eq.s32.totalorder %s838_s3, 0  ;;  %p141_p7 = scmp.eq.s32.totalorder %s838_s3, 1 }
  0x12   : > { %s854_s25 = scalar_select %p29_p1, %s773_s19, %s31_s23  }
  0x13   : > { %p856_p5 = por %p39_p2, %p38_p0  ;;  %p860_p6 = por %p45_p4, %p44_p3 }
  0x14   : > { %1098 = sst [smem:[#allocation16_spill]] %s854_s25  ;;  %p147_p8 = scmp.eq.s32.totalorder %s533_s21, 1 }
  0x15   : > { %s1100_s27 = scalar_select %p860_p6, 1, 0 }
  0x16   : > { %p573_p10 = scmp.lt.s32.totalorder %s777_s20, 2  ;;  %p867_p11 = por %p141_p7, %p38_p0 }
  0x17   : > { %p871_p12 = por %p147_p8, %p44_p3  ;;  %s876_s30 = sand.u32 1, %s773_s19  }
  0x18   : > { %s1101_s28 = scalar_select %p867_p11, 1, 0 }
  0x19   : > { %s1102_s29 = scalar_select %p871_p12, 1, 0 }
  0x1a   : > { %s879_s5 = sshll.u32 %s777_s20, 6  ;;  %s536_s6 = sshll.u32 %s876_s30, 3 }
  0x1b   : > { %1103 = sst [smem:[#allocation17_spill]] %s1102_s29  ;;  %s174_s10 = scalar_lea.vmem [#allocation3], %s536_s6 }
  0x1c   : > { %s1104_s0 = sld [smem:[#allocation18_spill]]  ;;  %s180_s11 = sshll.u32 %s174_s10, 4  ;;  %s894_s11 = int_to_ptr.vmem [resolvable:$true] %s180_s11 }
  0x1d   : > { %p890_p13 = pnand %p573_p10, %p856_p5  ;;  %s190_s13 = sand.u32 1, %s777_s20  }
  0x1e   : > { %s1085_s14 = sshll.u32 %s876_s30, 2  ;;  %s1106_s1 = sld [smem:[#allocation19_spill]] }
  0x1f   : > { %s194_s23 = scalar_lea.vmem [#allocation6], %s1085_s14  ;;  %s908_s26 = scalar_lea.sflag [#allocation7], %s190_s13 }
  0x20   : > { %s201_s24 = sshll.u32 %s194_s23, 4  ;;  %p914_p3 = pneg %p890_p13  ;;  %s202_s24 = int_to_ptr.vmem [resolvable:$true] %s201_s24 }
  0x22   : > { %s886_s9 = scalar_lea.hbm %s1104_s0, %s879_s5 }
  0x24   : > { %s902_s21 = scalar_lea.hbm %s1106_s1, %s879_s5  ;;  %s630_s15 = scalar_lea.hbm %s1106_s1, 128 }
  0x25   : > { %s625_s6 = scalar_lea.hbm %s902_s21, 64  ;;  %p631_p7 = scmp.lt.s32.totalorder %s902_s21, %s1106_s1 }
  0x26   : > { %p626_p2 = scmp.ne.s32.totalorder %s902_s21, %s625_s6  ;;  %p632_p8 = scmp.lt.s32.totalorder %s630_s15, %s625_s6 }
  0x28   : > { %p628_p4 = pnand %p914_p3, %p626_p2  ;;  %p633_p10 = por %p632_p8, %p631_p7 }
  0x2a   : > { %p629_p5 = pneg %p628_p4 }
  0x2c   : > { %p634_p9 = pnand %p633_p10, %p629_p5 }
  0x2e   : > { %637 = shalt.err (!%p634_p9)
}
  0x2f   : > { %s638_s13 = scalar_lea.vmem %s202_s24, 64  ;;  %s779_s14 = smov [#allocation6]  }
  0x30   : > { %p639_p0 = scmp.ne.s32.totalorder %s202_s24, %s638_s13  ;;  %s643_s25 = sshll.u32 %s779_s14, 4  ;;  %s644_s25 = int_to_ptr.vmem [resolvable:$false] %s643_s25 }
  0x31   : > { %s645_s19 = scalar_lea.vmem %s644_s25, 128  ;;  %p646_p2 = scmp.lt.s32.totalorder %s202_s24, %s644_s25 }
  0x32   : > { %p641_p1 = pnand %p639_p0, %p914_p3  ;;  %p647_p4 = scmp.lt.s32.totalorder %s645_s19, %s638_s13 }
  0x34   : > { %p642_p12 = pneg %p641_p1  ;;  %p648_p11 = por %p647_p4, %p646_p2 }
  0x36   : > { %p649_p6 = pnand %p648_p11, %p642_p12 }
  0x38   : > { %652 = shalt.err (!%p649_p6)
}
  0x39   : > { %565 = dma.hbm_to_vmem [thread:$0]  (!%p890_p13), %s902_s21, 64, %s202_s24, %s908_s26  }
  0x3a   : > { %p1108_p9 = scmp.lt.s32.totalorder %s777_s20, 3  ;;  %p1109_p0 = scmp.ge.s32.totalorder %s777_s20, 1 }
  0x3b   : > { %s171_s19 = scalar_lea.sflag [#allocation4], %s876_s30  ;;  %s653_s14 = scalar_lea.hbm %s886_s9, 128 }
  0x3c   : > { %p937_p1 = pnand %p1109_p0, %p1108_p9  ;;  %p654_p6 = scmp.ne.s32.totalorder %s886_s9, %s653_s14 }
  0x3d   : > { %s658_s10 = scalar_lea.hbm %s1104_s0, 256  ;;  %p659_p5 = scmp.lt.s32.totalorder %s886_s9, %s1104_s0 }
  0x3e   : > { %s1110_s25 = scalar_select %p937_p1, 1, 0 }
  0x3f   : > { %p656_p11 = pnand %p654_p6, %p914_p3  ;;  %p660_p7 = scmp.lt.s32.totalorder %s658_s10, %s653_s14 }
  0x41   : > { %p657_p12 = pneg %p656_p11  ;;  %p661_p8 = por %p660_p7, %p659_p5 }
  0x43   : > { %p662_p10 = pnand %p661_p8, %p657_p12 }
  0x45   : > { %665 = shalt.err (!%p662_p10)
}
  0x46   : > { %s666_s21 = scalar_lea.vmem %s894_s11, 128  ;;  %s780_s24 = smov [#allocation3]  }
  0x47   : > { %p667_p2 = scmp.ne.s32.totalorder %s894_s11, %s666_s21  ;;  %s671_s23 = sshll.u32 %s780_s24, 4  ;;  %s672_s23 = int_to_ptr.vmem [resolvable:$false] %s671_s23 }
  0x48   : > { %s673_s13 = scalar_lea.vmem %s672_s23, 256  ;;  %p674_p0 = scmp.lt.s32.totalorder %s894_s11, %s672_s23 }
  0x49   : > { %p669_p4 = pnand %p667_p2, %p914_p3  ;;  %p675_p6 = scmp.lt.s32.totalorder %s673_s13, %s666_s21 }
  0x4b   : > { %p670_p9 = pneg %p669_p4  ;;  %p676_p11 = por %p675_p6, %p674_p0 }
  0x4d   : > { %p677_p1 = pnand %p676_p11, %p670_p9 }
  0x4f   : > { %680 = shalt.err (!%p677_p1)
}
  0x50   : > { %s781_s14 = smov 128   ;;  %s782_s6 = smov 64  }
  0x51   : > { %s783_s8 = smov 4   ;;  %s217_s16 = scalar_lea.hbm %s1082_s2, %s879_s5 }
  0x52   : > { %562 = dma.hbm_to_vmem [thread:$0]  (!%p890_p13), %s886_s9, 128, %s894_s11, %s171_s19, %s781_s14, %s782_s6, %s783_s8  }
  0x53   : > { %s1111_s21 = sshll.u32 %s876_s30, 2  ;;  %s681_s13 = scalar_lea.hbm %s217_s16, 64 }
  0x54   : > { %s212_s24 = scalar_lea.vmem [#allocation8], %s1111_s21  ;;  %p682_p1 = scmp.ne.s32.totalorder %s217_s16, %s681_s13 }
  0x55   : > { %s219_s23 = sshll.u32 %s212_s24, 4  ;;  %s686_s22 = scalar_lea.hbm %s1082_s2, 128  ;;  %s220_s23 = int_to_ptr.vmem [resolvable:$true] %s219_s23 }
  0x56   : > { %p684_p12 = pnand %p682_p1, %p914_p3  ;;  %p687_p7 = scmp.lt.s32.totalorder %s217_s16, %s1082_s2 }
  0x57   : > { %p688_p8 = scmp.lt.s32.totalorder %s686_s22, %s681_s13 }
  0x58   : > { %p685_p5 = pneg %p684_p12 }
  0x59   : > { %p689_p10 = por %p688_p8, %p687_p7 }
  0x5b   : > { %p690_p2 = pnand %p689_p10, %p685_p5 }
  0x5d   : > { %693 = shalt.err (!%p690_p2)
}
  0x5e   : > { %s694_s30 = scalar_lea.vmem %s220_s23, 64  ;;  %s784_s5 = smov [#allocation8]  }
  0x5f   : > { %p695_p4 = scmp.ne.s32.totalorder %s220_s23, %s694_s30  ;;  %s699_s9 = sshll.u32 %s784_s5, 4  ;;  %s700_s9 = int_to_ptr.vmem [resolvable:$false] %s699_s9 }
  0x60   : > { %s701_s11 = scalar_lea.vmem %s700_s9, 128  ;;  %p702_p6 = scmp.lt.s32.totalorder %s220_s23, %s700_s9 }
  0x61   : > { %p697_p9 = pnand %p695_p4, %p914_p3  ;;  %p703_p11 = scmp.lt.s32.totalorder %s701_s11, %s694_s30 }
  0x63   : > { %p698_p0 = pneg %p697_p9  ;;  %p704_p1 = por %p703_p11, %p702_p6 }
  0x65   : > { %p705_p12 = pnand %p704_p1, %p698_p0 }
  0x67   : > { %708 = shalt.err (!%p705_p12)
}
  0x68   : > { %568 = dma.hbm_to_vmem [thread:$0]  (!%p890_p13), %s217_s16, 64, %s220_s23, %s908_s26  }
  0x69   : > { %p1112_p5 = scmp.ne.s32.totalorder %s1110_s25, 0 }
  0x6a   : > { %s986_s0 = sand.u32 (!%p1112_p5), 1, %s769_s18   ;;  %p1113_p3 = scmp.ne.s32.totalorder (!%p1112_p5), %s1100_s27, 0 }
  0x6b   : > { %228 = sbr.rel (%p1112_p5) target bundleno = 391 (0x187), region = 36  ;;  %s543_s1 = sshll.u32 (!%p1112_p5), %s986_s0, 3 }
  0x6c   : > { %s231_s20 = scalar_lea.sflag (!%p1112_p5), [#allocation4], %s986_s0  ;;  %s234_s22 = scalar_lea.vmem (!%p1112_p5), [#allocation3], %s543_s1 }
  0x70   : > { %752 = dma.done.wait (%p1113_p3), %s231_s20, 128  }
  0x71   : > { %754 = vsyncadd (%p1113_p3), %s231_s20, 4294967168  ;;  %s239_s29 = sand.u32 1, %s838_s3   ;;  %s544_s12 = sshll.u32 %s986_s0, 2 }
  0x72   : > { %s240_s26 = scalar_lea.sflag [#allocation7], %s239_s29  ;;  %s1000_s7 = scalar_lea.vmem [#allocation6], %s544_s12 }
  0x73   : > { %756 = dma.done.wait (%p1113_p3), %s240_s26, 128  }
  0x74   : > { %758 = vsyncadd (%p1113_p3), %s240_s26, 4294967168  ;;  %vm289_vm0 = vcmask 1043456   ;;  %v1006_v0 = vld [vmem:[%s234_s22] sm:$0xf]  ;;  %v1012_v3 = vld [vmem:[%s234_s22 + $0x4] sm:$0xf] }
  0x75   : > { %v290_v1 = vsel %vm289_vm0, %v1006_v0, 0.0  ;;  %v308_v2 = vmul.f32 %v1006_v0, %v1006_v0  ;;  %v309_v4 = vmul.f32 %v1012_v3, %v1012_v3  ;;  %v299_v6 = vsel %vm289_vm0, %v1012_v3, 0.0  ;;  %s385_s27 = sld [smem:[#allocation2]]  ;;  %s252_s19 = scalar_lea.vmem [#allocation8], %s544_s12 }
  0x76   : > { %291 = vadd.xlane.f32.xlu0 %v290_v1  ;;  %s548_s14 = sshll.u32 %s838_s3, 6  ;;  %s286_s6 = scalar_lea.vmem [#allocation9], %s543_s1 }
  0x77   : > { %v310_v5 = vsel %vm289_vm0, %v308_v2, 0.0  ;;  %v319_v7 = vsel %vm289_vm0, %v309_v4, 0.0  ;;  %s417_s8 = sshll.u32 %s286_s6, 4  ;;  %s1035_s16 = scalar_lea.hbm %s1084_s4, %s548_s14  ;;  %s1037_s8 = int_to_ptr.vmem [resolvable:$true] %s417_s8 }
  0x78   : > { %311 = vadd.xlane.f32.xlu1 %v310_v5  ;;  %s405_s3 = scalar_lea.sflag [#allocation5], %s986_s0  ;;  %s709_s21 = scalar_lea.vmem %s1037_s8, 128 }
  0x79   : > { %p710_p13 = scmp.ne.s32.totalorder %s1037_s8, %s709_s21  ;;  %p1114_p7 = scmp.ne.s32.totalorder %s1101_s28, 0 }
  0x7a   : > { %300 = vadd.xlane.f32.xlu0 %v299_v6  ;;  %s785_s24 = smov [#allocation9]  }
  0x7b   : > { %s390_s25 = ssub.f32 1.0, %s385_s27  ;;  %p711_p8 = pnand %p710_p13, %p1114_p7 }
  0x7c   : > { %320 = vadd.xlane.f32.xlu1 %v319_v7  ;;  %s713_s23 = sshll.u32 %s785_s24, 4  ;;  %s714_s23 = int_to_ptr.vmem [resolvable:$false] %s713_s23 }
  0x7d   : > { %p712_p10 = pneg %p711_p8  ;;  %s715_s13 = scalar_lea.vmem %s714_s23, 256 }
  0x7e   : > { %p716_p2 = scmp.lt.s32.totalorder %s1037_s8, %s714_s23  ;;  %p717_p4 = scmp.lt.s32.totalorder %s715_s13, %s709_s21 }
  0x80   : > { %p718_p9 = por %p717_p4, %p716_p2 }
  0x82   : > { %p719_p0 = pnand %p718_p9, %p712_p10 }
  0xff   : > { %v292_v8 = vpop.xlane.xlu0 %291 }
 0x100   : > { %v293_v9 = vrot.slane %v292_v8, 4 }
 0x101   : > { %v312_v10 = vpop.xlane.xlu1 %311 }
 0x102   : > { %v294_v11 = vadd.f32 %v293_v9, %v292_v8  ;;  %v313_v12 = vrot.slane %v312_v10, 4 }
 0x103   : > { %v301_v13 = vpop.xlane.xlu0 %300 }
 0x104   : > { %v295_v14 = vrot.slane %v294_v11, 2  ;;  %v314_v15 = vadd.f32 %v313_v12, %v312_v10  ;;  %v302_v16 = vrot.slane %v301_v13, 4 }
 0x105   : > { %v321_v17 = vpop.xlane.xlu1 %320 }
 0x106   : > { %v296_v18 = vadd.f32 %v295_v14, %v294_v11  ;;  %v315_v19 = vrot.slane %v314_v15, 2  ;;  %v303_v20 = vadd.f32 %v302_v16, %v301_v13  ;;  %v322_v21 = vrot.slane %v321_v17, 4 }
 0x108   : > { %v297_v22 = vrot.slane %v296_v18, 1  ;;  %v316_v23 = vadd.f32 %v315_v19, %v314_v15  ;;  %v304_v24 = vrot.slane %v303_v20, 2  ;;  %v323_v25 = vadd.f32 %v322_v21, %v321_v17  ;;  %v386_v21 = vld [vmem:[%s1000_s7] sm:$0xf] }
 0x109   : > { %v391_v19 = vstv %s390_s25 }
 0x10a   : > { %v298_v26 = vadd.f32 %v297_v22, %v296_v18  ;;  %v305_v27 = vadd.f32 %v304_v24, %v303_v20  ;;  %v324_v28 = vrot.slane %v323_v25, 2  ;;  %v317_v30 = vrot.slane %v316_v23, 1 }
 0x10b   : > { %v388_v22 = vstv %s385_s27 }
 0x10c   : > { %v328_v29 = vmul.f32 0.001953125, %v298_v26  ;;  %v306_v31 = vrot.slane %v305_v27, 1  ;;  %v325_v32 = vadd.f32 %v324_v28, %v323_v25  ;;  %v318_v35 = vadd.f32 %v317_v30, %v316_v23  ;;  %v387_v26 = vld [vmem:[%s252_s19] sm:$0xf] }
 0x10d   : > { %v389_v24 = vmul.f32 %v388_v22, %v386_v21 }
 0x10e   : > { %v330_v33 = vmul.f32 512.0, %v328_v29  ;;  %v307_v34 = vadd.f32 %v306_v31, %v305_v27  ;;  %v326_v38 = vrot.slane %v325_v32, 1  ;;  %v360_v61 = vsub.f32 %v1006_v0, %v328_v29 }
 0x110   : > { %v332_v36 = vmul.f32 %v330_v33, %v328_v29  ;;  %v329_v37 = vmul.f32 0.001953125, %v307_v34  ;;  %v327_v42 = vadd.f32 %v326_v38, %v325_v32 }
 0x112   : > { %v334_v39 = vsub.f32 %v318_v35, %v332_v36  ;;  %v331_v40 = vmul.f32 512.0, %v329_v37  ;;  %v361_v62 = vsub.f32 %v1012_v3, %v329_v37 }
 0x114   : > { %v336_v41 = vmul.f32 0.0019569471, %v334_v39  ;;  %v333_v43 = vmul.f32 %v331_v40, %v329_v37 }
 0x116   : > { %v338_v44 = vmax.f32 %v336_v41, 0.0  ;;  %v335_v45 = vsub.f32 %v327_v42, %v333_v43 }
 0x118   : > { %613 = vrsqrt.f32 %v338_v44  ;;  %v337_v46 = vmul.f32 0.0019569471, %v335_v45  ;;  %vm342_vm1 = vcmp.eq.f32.partialorder %v338_v44, inf  ;;  %v345_v50 = vand.u32 2147483648, %v338_v44 }
 0x119   : > { %vm344_vm2 = vcmp.eq.f32.partialorder %v338_v44, 0.0 }
 0x11a   : > { %v339_v47 = vmax.f32 %v337_v46, 0.0 }
 0x11c   : > { %615 = vrsqrt.f32 %v339_v47  ;;  %vm349_vm3 = vcmp.eq.f32.partialorder %v339_v47, inf  ;;  %v352_v56 = vand.u32 2147483648, %v339_v47  ;;  %vm351_vm4 = vcmp.eq.f32.partialorder %v339_v47, 0.0 }
 0x125   : > { %v614_v48 = vpop.eup %613 }
 0x126   : > { %v341_v49 = vmul.f32 %v614_v48, %v338_v44 }
 0x128   : > { %v343_v51 = vsel %vm342_vm1, %v338_v44, %v341_v49 }
 0x129   : > { %v346_v52 = vsel %vm344_vm2, %v345_v50, %v343_v51  ;;  %v616_v53 = vpop.eup %615 }
 0x12a   : > { %v354_v54 = vadd.f32 1e-05, %v346_v52  ;;  %v348_v55 = vmul.f32 %v616_v53, %v339_v47 }
 0x12c   : > { %617 = vrcp.f32 %v354_v54  ;;  %v350_v57 = vsel %vm349_vm3, %v339_v47, %v348_v55 }
 0x12d   : > { %v353_v58 = vsel %vm351_vm4, %v352_v56, %v350_v57 }
 0x12e   : > { %v355_v59 = vadd.f32 1e-05, %v353_v58 }
 0x130   : > { %619 = vrcp.f32 %v355_v59 }
 0x139   : > { %v618_v60 = vpop.eup %617 }
 0x13a   : > { %v362_v63 = vmul.f32 %v618_v60, %v360_v61 }
 0x13c   : > { %v364_v4 = vsel %vm289_vm0, %v362_v63, 0.0  ;;  %v394_v29 = vmul.f32 %v389_v24, %v362_v63 }
 0x13d   : > { %v620_v1 = vpop.eup %619 }
 0x13e   : > { %v363_v2 = vmul.f32 %v620_v1, %v361_v62 }
 0x140   : > { %v365_v5 = vsel %vm289_vm0, %v363_v2, 0.0  ;;  %v395_v30 = vmul.f32 %v389_v24, %v363_v2 }
 0x141   : > { %v366_v6 = vadd.f32 %v365_v5, %v364_v4 }
 0x143   : > { %v367_v7 = vmul.f32 0.5, %v366_v6 }
 0x145   : > { %v368_v8 = vsub.f32 %v362_v63, %v367_v7  ;;  %v369_v9 = vsub.f32 %v363_v2, %v367_v7 }
 0x147   : > { %v370_v10 = vmul.f32 %v368_v8, %v368_v8  ;;  %v371_v11 = vmul.f32 %v369_v9, %v369_v9 }
 0x149   : > { %v372_v12 = vsel %vm289_vm0, %v370_v10, 0.0  ;;  %v373_v13 = vsel %vm289_vm0, %v371_v11, 0.0 }
 0x14a   : > { %v374_v0 = vadd.f32 %v373_v13, %v372_v12 }
 0x14c   : > { %621 = vrsqrt.f32 %v374_v0  ;;  %vm377_vm5 = vcmp.eq.f32.partialorder %v374_v0, inf  ;;  %v380_v15 = vand.u32 2147483648, %v374_v0  ;;  %vm379_vm6 = vcmp.eq.f32.partialorder %v374_v0, 0.0 }
 0x159   : > { %v622_v3 = vpop.eup %621 }
 0x15a   : > { %v376_v14 = vmul.f32 %v622_v3, %v374_v0 }
 0x15c   : > { %v378_v16 = vsel %vm377_vm5, %v374_v0, %v376_v14 }
 0x15d   : > { %v381_v17 = vsel %vm379_vm6, %v380_v15, %v378_v16 }
 0x15e   : > { %v382_v18 = vadd.f32 1e-05, %v381_v17 }
 0x160   : > { %623 = vrcp.f32 %v382_v18 }
 0x16d   : > { %v624_v20 = vpop.eup %623 }
 0x16e   : > { %v392_v23 = vmul.f32 %v624_v20, %v391_v19 }
 0x170   : > { %v393_v25 = vmul.f32 %v392_v23, %v386_v21 }
 0x172   : > { %v396_v27 = vmul.f32 %v393_v25, %v368_v8  ;;  %v397_v28 = vmul.f32 %v393_v25, %v369_v9 }
 0x174   : > { %v398_v31 = vadd.f32 %v396_v27, %v387_v26  ;;  %v399_v32 = vadd.f32 %v397_v28, %v387_v26 }
 0x176   : > { %v400_v33 = vadd.f32 %v398_v31, %v394_v29  ;;  %v401_v34 = vadd.f32 %v399_v32, %v395_v30 }
 0x178   : > { %402 = vst [vmem:[%s286_s6] sm:$0xf] %v400_v33  ;;  %403 = vst [vmem:[%s286_s6 + $0x4] sm:$0xf] %v401_v34 }
 0x179   : > { %722 = shalt.err (!%p719_p0)
}
 0x17a   : > { %s723_s30 = scalar_lea.hbm %s1035_s16, 128  ;;  %s727_s11 = scalar_lea.hbm %s1084_s4, 256 }
 0x17b   : > { %p724_p6 = scmp.ne.s32.totalorder %s1035_s16, %s723_s30  ;;  %p728_p12 = scmp.lt.s32.totalorder %s1035_s16, %s1084_s4 }
 0x17c   : > { %p729_p5 = scmp.lt.s32.totalorder %s727_s11, %s723_s30 }
 0x17d   : > { %p725_p11 = pnand %p724_p6, %p1114_p7 }
 0x17e   : > { %p730_p3 = por %p729_p5, %p728_p12 }
 0x17f   : > { %p726_p1 = pneg %p725_p11 }
 0x181   : > { %p731_p13 = pnand %p730_p3, %p726_p1 }
 0x183   : > { %734 = shalt.err (!%p731_p13)
}
 0x184   : > { %s786_s22 = smov 64   ;;  %s787_s29 = smov 128  }
 0x185   : > { %s788_s12 = smov 4  }
 0x186   : > { %557 = dma.vmem_to_hbm [thread:$0]  (%p1114_p7), %s1037_s8, 128, %s1035_s16, %s405_s3, %s786_s22, %s787_s29, %s788_s12  }
 0x187 PF: > { %s1115_s26 = sld [smem:[#allocation17_spill]]  ;;  %s432_s27 = sand.u32 1, %s765_s17  }
 0x188   : > { %s1116_s7 = sld [smem:[#allocation14_spill]]  ;;  %s433_s25 = scalar_lea.sflag [#allocation5], %s432_s27 }
 0x18d   : > { %p1117_p8 = scmp.ne.s32.totalorder %s1115_s26, 0 }
 0x18e   : > { %p1118_p10 = scmp.ge.s32.totalorder %s1116_s7, 2 }
 0x190   : > { %p570_p2 = pnand %p1118_p10, %p1117_p8 }
 0x192   : > { %p571_p4 = pneg %p570_p2 }
 0x194   : > { %760 = dma.done.wait (%p571_p4), %s433_s25, 128  }
 0x195   : > { %762 = vsyncadd (%p571_p4), %s433_s25, 4294967168  ;;  %s1119_s20 = sld [smem:[#allocation15_spill]]  ;;  %s1122_s17 = smov %s769_s18 }
 0x196   : > { %s1120_s19 = sld [smem:[#allocation13_spill]] }
 0x197   : > { %s1121_s14 = sld [smem:[#allocation16_spill]] }
 0x19b   : > { %p21_p9 = scmp.ge.s32.totalorder %s1119_s20, 4  }
 0x19c   : > { %s1123_s18 = smov %s1120_s19 }
 0x19d   : > { %s1124_s19 = smov %s1121_s14  ;;  %23 = sbr.rel (!%p21_p9) target bundleno = 11 (0xb), region = 105 }
 0x1a2   :  { %438 = vsyncpa [#allocation4], 1 }
 0x1a3   :  { %440 = vsyncpa [#allocation4 + $0x1], 1 }
 0x1a4   :  { %441 = vsyncpa [#allocation7], 1 }
 0x1a5   :  { %443 = vsyncpa [#allocation7 + $0x1], 1 }
 0x1a6   :  { %444 = vsyncpa [#allocation5], 1 }
 0x1a7   :  { %446 = vsyncpa [#allocation5 + $0x1], 1 }

</bundles_post_ra>
